<compile_context>
chip_gen: v5e
topology: v5e:2x2
jax: 0.10.0
libtpu: 0.0.40
codegen_flags: <defaults>
</compile_context>

<pallas_src>
import jax
import jax.numpy as jnp
from jax.experimental import pallas as pl
from jax.experimental.pallas import tpu as pltpu

N_TARGET_NODES = 32          # node count == feature count (connectome model)
PACK = 4                     # graphs packed per 128-lane tile
LANES = PACK * N_TARGET_NODES
assert LANES == 128


# --------------------------------------------------------------------------------------
# Pallas kernel: one packed group (disjoint union of PACK graphs) per grid step.
# --------------------------------------------------------------------------------------
def discriminator_kernel(xt_ref, adjt_ref, w1t_ref, b1t_ref, w2t_ref, b2_ref, o_ref):
    #   xt_ref   : (1, N, PACK*N)       X_union^T               (bf16)
    #   adjt_ref : (1, PACK*N, PACK*N)  block-diag A_hat_union^T (bf16)
    #   w1t_ref  : (N, N)  W1^T (bf16);   b1t_ref : (N, 1) f32
    #   w2t_ref  : (1, N)  W2^T (bf16);   b2_ref  : (1,)   f32 scalar in SMEM
    #   o_ref    : (1, 1, PACK*N) f32  -> sigmoid(out)^T, fully lane-dense
    xt = xt_ref[0]        # (N, PN)
    adjt = adjt_ref[0]    # (PN, PN)

    # Layer 1 (transposed): h1^T = sigmoid(W1^T @ X^T @ A_hat^T + b1^T)
    t = jnp.dot(w1t_ref[...], xt, preferred_element_type=jnp.float32)               # (N, PN)
    z1 = jnp.dot(t.astype(jnp.bfloat16), adjt, preferred_element_type=jnp.float32)  # (N, PN)
    h1t = jax.nn.sigmoid(z1 + b1t_ref[...])                                         # f32 (N, PN)
    # TODO(synk): F.dropout(training=True) is stochastic; eval-mode (identity) dropout here.

    # Layer 2 (transposed, reassociated): out^T = sigmoid(W2^T @ h1^T @ A_hat^T + b2)
    u = jnp.dot(w2t_ref[...], h1t.astype(jnp.bfloat16),
                preferred_element_type=jnp.float32)                                 # (1, PN)
    z2 = jnp.dot(u.astype(jnp.bfloat16), adjt, preferred_element_type=jnp.float32)  # (1, PN)
    o_ref[0] = jax.nn.sigmoid(z2 + b2_ref[0])


# --------------------------------------------------------------------------------------
# Plain-JAX glue
# --------------------------------------------------------------------------------------
def build_norm_adj(edge_index, n):
    """Dense D^{-1/2}(A + I)D^{-1/2} matching PyG gcn_norm (source->target flow).
    Precompute & cache this per graph (GCNConv(cached=True))."""
    src, dst = edge_index[0], edge_index[1]
    a = jnp.zeros((n, n), jnp.float32).at[dst, src].add(1.0)
    a = a + jnp.eye(n, dtype=jnp.float32)            # add self-loops
    deg = a.sum(axis=1)
    deg_inv_sqrt = jnp.where(deg > 0.0, jax.lax.rsqrt(deg), 0.0)
    return deg_inv_sqrt[:, None] * a * deg_inv_sqrt[None, :]


def pack_batch(x_batch, adj_batch):
    """Pack B graphs into ceil(B/PACK) disjoint-union groups, transposed & lane-packed."""
    b, n, _ = x_batch.shape
    g = -(-b // PACK)
    pad = g * PACK - b
    if pad:
        x_batch = jnp.concatenate([x_batch, jnp.zeros((pad, n, n), x_batch.dtype)], 0)
        adj_batch = jnp.concatenate([adj_batch, jnp.zeros((pad, n, n), adj_batch.dtype)], 0)
    # X_union^T : [G, N_feat, PACK*N_nodes]
    x_grp = x_batch.reshape(g, PACK, n, n)
    xt_pack = x_grp.transpose(0, 3, 1, 2).reshape(g, n, PACK * n)
    # block-diag A_hat_union^T : [G, PACK*N, PACK*N]
    adj_grp = adj_batch.reshape(g, PACK, n, n)
    adjt_pack = jnp.zeros((g, PACK * n, PACK * n), adj_batch.dtype)
    for p in range(PACK):  # static, tiny
        adjt_pack = adjt_pack.at[:, p * n:(p + 1) * n, p * n:(p + 1) * n].set(
            jnp.swapaxes(adj_grp[:, p], 1, 2))
    return xt_pack, adjt_pack


def discriminator_forward_batched(params, x_batch, adj_batch):
    """x_batch: [B, N, N] squeezed node features; adj_batch: [B, N, N] cached A_hat.
    Returns [B, N, 1] per-node sigmoid scores (same semantics as the PyTorch module)."""
    n = N_TARGET_NODES
    b = x_batch.shape[0]
    xt_pack, adjt_pack = pack_batch(x_batch.astype(jnp.float32),
                                    adj_batch.astype(jnp.float32))
    g = xt_pack.shape[0]
    pn = PACK * n

    # bf16 only at the MXU inputs; bias adds / sigmoid / accumulation stay f32.
    xt_pack = xt_pack.astype(jnp.bfloat16)
    adjt_pack = adjt_pack.astype(jnp.bfloat16)
    w1t = params["w1"].T.astype(jnp.bfloat16)                 # (N, N)
    b1t = params["b1"].reshape(n, 1).astype(jnp.float32)      # (N, 1)
    w2t = params["w2"].T.astype(jnp.bfloat16)                 # (1, N)
    b2 = params["b2"].reshape(1).astype(jnp.float32)          # (1,) -> SMEM

    out_t = pl.pallas_call(
        discriminator_kernel,
        out_shape=jax.ShapeDtypeStruct((g, 1, pn), jnp.float32),
        grid=(g,),
        in_specs=[
            pl.BlockSpec((1, n, pn), lambda i: (i, 0, 0)),       # X_union^T per group
            pl.BlockSpec((1, pn, pn), lambda i: (i, 0, 0)),      # A_hat_union^T per group
            pl.BlockSpec((n, n), lambda i: (0, 0)),              # W1^T (shared)
            pl.BlockSpec((n, 1), lambda i: (0, 0)),              # b1^T (shared)
            pl.BlockSpec((1, n), lambda i: (0, 0)),              # W2^T (shared)
            pl.BlockSpec(memory_space=pltpu.MemorySpace.SMEM),   # b2 scalar
        ],
        out_specs=pl.BlockSpec((1, 1, pn), lambda i: (i, 0, 0)),
        compiler_params=pltpu.CompilerParams(
            dimension_semantics=("parallel",)),                  # v7x: both TensorCores
    )(xt_pack, adjt_pack, w1t, b1t, w2t, b2)

    out = out_t.reshape(g * PACK, n)[:b]     # un-pack groups, drop padded graphs
    return out[:, :, None]                   # [B, N, 1]


def discriminator_forward(params, x, edge_index):
    """Module-equivalent single-graph forward: x = data.x (squeezed inside), edge_index [2, E]."""
    n = N_TARGET_NODES
    x2d = jnp.squeeze(x).astype(jnp.float32)
    adj = build_norm_adj(edge_index, n)      # cache across calls (GCNConv cached=True)
    return discriminator_forward_batched(params, x2d[None], adj[None])[0]


def discriminator_reference(params, x_batch, adj_batch):
    """Pure-JAX f32 reference (PyTorch semantics, eval-mode dropout)."""
    def one(x, adj):
        h1 = jax.nn.sigmoid(adj @ (x @ params["w1"]) + params["b1"])
        return jax.nn.sigmoid(adj @ (h1 @ params["w2"]) + params["b2"])
    return jax.vmap(one)(x_batch, adj_batch)


def glorot(key, shape):
    fan_in, fan_out = shape[0], shape[1]
    limit = jnp.sqrt(6.0 / (fan_in + fan_out))
    return jax.random.uniform(key, shape, jnp.float32, -limit, limit)


def init_params(key, n):
    k1, k2 = jax.random.split(key)
    return {
        "w1": glorot(k1, (n, n)),                 # GCNConv(N, N) weight
        "b1": jnp.zeros((1, n), jnp.float32),     # GCNConv(N, N) bias
        "w2": glorot(k2, (n, 1)),                 # GCNConv(N, 1) weight
        "b2": jnp.zeros((1, 1), jnp.float32),     # GCNConv(N, 1) bias
    }


if __name__ == "__main__":
    n = N_TARGET_NODES
    B = 6                                         # exercises PACK padding (6 -> 2 groups of 4)
    key = jax.random.PRNGKey(0)
    kparams, kdata = jax.random.split(key)
    params = init_params(kparams, n)

    xs, adjs = [], []
    for kb in jax.random.split(kdata, B):
        kx, ksrc, koff = jax.random.split(kb, 3)
        x = jax.random.normal(kx, (n, 1, n), jnp.float32)       # data.x with singleton dim
        num_edges = 3 * n
        src = jax.random.randint(ksrc, (num_edges,), 0, n)
        off = jax.random.randint(koff, (num_edges,), 1, n)
        dst = (src + off) % n
        edge_index = jnp.stack([src, dst]).astype(jnp.int32)    # data.pos_edge_index
        xs.append(jnp.squeeze(x))
        adjs.append(build_norm_adj(edge_index, n))               # cached A_hat per graph
    x_batch = jnp.stack(xs)                                      # [B, N, N]
    adj_batch = jnp.stack(adjs)                                  # [B, N, N]

    fwd = jax.jit(discriminator_forward_batched)
    out = jax.block_until_ready(fwd(params, x_batch, adj_batch))  # [B, N, 1]

    ref = discriminator_reference(params, x_batch, adj_batch)
    assert out.shape == (B, n, 1), out.shape
    assert bool(jnp.all(jnp.isfinite(out)))
    assert bool(jnp.all((out >= 0.0) & (out <= 1.0)))            # sigmoid range
    assert bool(jnp.allclose(out, ref, atol=5e-2)), float(jnp.max(jnp.abs(out - ref)))
    print("KERNEL_OK")
</pallas_src>

<mosaic_0001>
module attributes {stable_mosaic.version = 11 : i64} {
  func.func @discriminator_kernel(%arg0: i32, %arg1: memref<1x32x128xbf16, #tpu.memory_space<vmem>>, %arg2: memref<1x128x128xbf16, #tpu.memory_space<vmem>>, %arg3: memref<32x32xbf16, #tpu.memory_space<vmem>>, %arg4: memref<32x1xf32, #tpu.memory_space<vmem>>, %arg5: memref<1x32xbf16, #tpu.memory_space<vmem>>, %arg6: memref<1xf32, #tpu.memory_space<smem>>, %arg7: memref<1x1x128xf32, #tpu.memory_space<vmem>>) attributes {dimension_semantics = [#tpu.dimension_semantics<parallel>], iteration_bounds = array<i64: 2>, scalar_prefetch = 0 : i64, scratch_operands = 0 : i64, tpu.core_type = #tpu.core_type<tc>, window_params = [{transform_indices = @transform_0, window_bounds = array<i64: 1, 32, 128>}, {transform_indices = @transform_1, window_bounds = array<i64: 1, 128, 128>}, {pipeline_mode = #tpu.pipeline_mode<synchronous>, transform_indices = @transform_2, window_bounds = array<i64: 32, 32>}, {pipeline_mode = #tpu.pipeline_mode<synchronous>, transform_indices = @transform_3, window_bounds = array<i64: 32, 1>}, {pipeline_mode = #tpu.pipeline_mode<synchronous>, transform_indices = @transform_4, window_bounds = array<i64: 1, 32>}, {transform_indices = @transform_5, window_bounds = array<i64: 1>}, {transform_indices = @transform_6, window_bounds = array<i64: 1, 1, 128>}]} {
    %c0 = arith.constant 0 : index
    %c0_0 = arith.constant 0 : index
    %c0_1 = arith.constant 0 : index
    %0 = vector.load %arg1[%c0, %c0_0, %c0_1] : memref<1x32x128xbf16, #tpu.memory_space<vmem>>, vector<1x32x128xbf16>
    %1 = vector.shape_cast %0 : vector<1x32x128xbf16> to vector<32x128xbf16>
    %c0_2 = arith.constant 0 : index
    %c0_3 = arith.constant 0 : index
    %c0_4 = arith.constant 0 : index
    %2 = vector.load %arg2[%c0_2, %c0_3, %c0_4] : memref<1x128x128xbf16, #tpu.memory_space<vmem>>, vector<1x128x128xbf16>
    %3 = vector.shape_cast %2 : vector<1x128x128xbf16> to vector<128x128xbf16>
    %c0_5 = arith.constant 0 : index
    %c0_6 = arith.constant 0 : index
    %4 = vector.load %arg3[%c0_5, %c0_6] : memref<32x32xbf16, #tpu.memory_space<vmem>>, vector<32x32xbf16>
    %cst = arith.constant dense<0.000000e+00> : vector<32x128xf32>
    %5 = tpu.matmul %4, %1, %cst {dimension_numbers = #tpu.dot_dimension_numbers<[1], [0], [0], [1], [0, 0, 1, 1], [], []>} : vector<32x32xbf16>, vector<32x128xbf16>, vector<32x128xf32> -> vector<32x128xf32>
    %6 = arith.truncf %5 : vector<32x128xf32> to vector<32x128xbf16>
    %cst_7 = arith.constant dense<0.000000e+00> : vector<32x128xf32>
    %7 = tpu.matmul %6, %3, %cst_7 {dimension_numbers = #tpu.dot_dimension_numbers<[1], [0], [0], [1], [0, 0, 1, 1], [], []>} : vector<32x128xbf16>, vector<128x128xbf16>, vector<32x128xf32> -> vector<32x128xf32>
    %c0_8 = arith.constant 0 : index
    %c0_9 = arith.constant 0 : index
    %8 = vector.load %arg4[%c0_8, %c0_9] : memref<32x1xf32, #tpu.memory_space<vmem>>, vector<32x1xf32>
    %9 = vector.broadcast %8 : vector<32x1xf32> to vector<32x128xf32>
    %10 = arith.addf %7, %9 : vector<32x128xf32>
    %11 = arith.negf %10 : vector<32x128xf32>
    %12 = math.exp %11 : vector<32x128xf32>
    %cst_10 = arith.constant 1.000000e+00 : f32
    %13 = vector.broadcast %cst_10 : f32 to vector<32x128xf32>
    %14 = arith.addf %13, %12 : vector<32x128xf32>
    %15 = arith.divf %13, %14 : vector<32x128xf32>
    %c0_11 = arith.constant 0 : index
    %c0_12 = arith.constant 0 : index
    %16 = vector.load %arg5[%c0_11, %c0_12] : memref<1x32xbf16, #tpu.memory_space<vmem>>, vector<1x32xbf16>
    %17 = arith.truncf %15 : vector<32x128xf32> to vector<32x128xbf16>
    %cst_13 = arith.constant dense<0.000000e+00> : vector<1x128xf32>
    %18 = tpu.matmul %16, %17, %cst_13 {dimension_numbers = #tpu.dot_dimension_numbers<[1], [0], [0], [1], [0, 0, 1, 1], [], []>} : vector<1x32xbf16>, vector<32x128xbf16>, vector<1x128xf32> -> vector<1x128xf32>
    %19 = arith.truncf %18 : vector<1x128xf32> to vector<1x128xbf16>
    %cst_14 = arith.constant dense<0.000000e+00> : vector<1x128xf32>
    %20 = tpu.matmul %19, %3, %cst_14 {dimension_numbers = #tpu.dot_dimension_numbers<[1], [0], [0], [1], [0, 0, 1, 1], [], []>} : vector<1x128xbf16>, vector<128x128xbf16>, vector<1x128xf32> -> vector<1x128xf32>
    %c0_15 = arith.constant 0 : index
    %21 = memref.load %arg6[%c0_15] : memref<1xf32, #tpu.memory_space<smem>>
    %22 = vector.broadcast %21 : f32 to vector<1x128xf32>
    %23 = arith.addf %20, %22 : vector<1x128xf32>
    %24 = arith.negf %23 : vector<1x128xf32>
    %25 = math.exp %24 : vector<1x128xf32>
    %cst_16 = arith.constant 1.000000e+00 : f32
    %26 = vector.broadcast %cst_16 : f32 to vector<1x128xf32>
    %27 = arith.addf %26, %25 : vector<1x128xf32>
    %28 = arith.divf %26, %27 : vector<1x128xf32>
    %c0_17 = arith.constant 0 : index
    %c0_18 = arith.constant 0 : index
    %c0_19 = arith.constant 0 : index
    %29 = vector.load %arg7[%c0_17, %c0_18, %c0_19] : memref<1x1x128xf32, #tpu.memory_space<vmem>>, vector<1x1x128xf32>
    %30 = vector.shape_cast %29 : vector<1x1x128xf32> to vector<1x128xf32>
    %31 = vector.shape_cast %28 : vector<1x128xf32> to vector<1x1x128xf32>
    tpu.vector_store %arg7[%c0_17, %c0_18, %c0_19], %31 {strides = array<i32>} : memref<1x1x128xf32, #tpu.memory_space<vmem>>, vector<1x1x128xf32>,
    return
  }
  func.func @transform_0(%arg0: i32) -> (i32, i32, i32) {
    %c0_i32 = arith.constant 0 : i32
    %c0_i32_0 = arith.constant 0 : i32
    %c0_i32_1 = arith.constant 0 : i32
    return %arg0, %c0_i32, %c0_i32_0 : i32, i32, i32
  }
  func.func @transform_1(%arg0: i32) -> (i32, i32, i32) {
    %c0_i32 = arith.constant 0 : i32
    %c0_i32_0 = arith.constant 0 : i32
    %c0_i32_1 = arith.constant 0 : i32
    return %arg0, %c0_i32, %c0_i32_0 : i32, i32, i32
  }
  func.func @transform_2(%arg0: i32) -> (i32, i32) {
    %c0_i32 = arith.constant 0 : i32
    %c0_i32_0 = arith.constant 0 : i32
    %c0_i32_1 = arith.constant 0 : i32
    return %c0_i32, %c0_i32_0 : i32, i32
  }
  func.func @transform_3(%arg0: i32) -> (i32, i32) {
    %c0_i32 = arith.constant 0 : i32
    %c0_i32_0 = arith.constant 0 : i32
    %c0_i32_1 = arith.constant 0 : i32
    return %c0_i32, %c0_i32_0 : i32, i32
  }
  func.func @transform_4(%arg0: i32) -> (i32, i32) {
    %c0_i32 = arith.constant 0 : i32
    %c0_i32_0 = arith.constant 0 : i32
    %c0_i32_1 = arith.constant 0 : i32
    return %c0_i32, %c0_i32_0 : i32, i32
  }
  func.func @transform_5(%arg0: i32) -> i32 {
    %c0_i32 = arith.constant 0 : i32
    %c0_i32_0 = arith.constant 0 : i32
    return %c0_i32 : i32
  }
  func.func @transform_6(%arg0: i32) -> (i32, i32, i32) {
    %c0_i32 = arith.constant 0 : i32
    %c0_i32_0 = arith.constant 0 : i32
    %c0_i32_1 = arith.constant 0 : i32
    return %arg0, %c0_i32, %c0_i32_0 : i32, i32, i32
  }
}

</mosaic_0001>

<bundles_post_ra>
// kernel: discriminator_forward_batched.1
= control target key start
LH: loop header
LB: loop body
LE: loop exit
PB: predicated region body
PF: predicated region fallthrough
CT: control target
= control target key end

     0   :  { %s784_s23 = smov 0   ;;  %s873_s0 = inlined_call_operand.vmem [shape: bf16[2,32,128], index: 0, kind: input, shape index: {}]   ;;  %s874_s1 = inlined_call_operand.vmem [shape: bf16[2,128,128], index: 1, kind: input, shape index: {}]   ;;  %s875_s2 = inlined_call_operand.vmem [shape: bf16[32,32], index: 2, kind: input, shape index: {}]   ;;  %s876_s3 = inlined_call_operand.vmem [shape: f32[32,1], index: 3, kind: input, shape index: {}]   ;;  %s877_s4 = inlined_call_operand.vmem [shape: bf16[1,32], index: 4, kind: input, shape index: {}]   ;;  %s878_s5 = inlined_call_operand.<no memory space> [shape: f32[1], index: 5, kind: input, shape index: {}]   ;;  %s879_s6 = inlined_call_operand.vmem [shape: f32[2,1,128], index: 6, kind: output, shape index: {}]  }
   0x1   :  { %11 = sst [smem:[#allocation2]] %s878_s5 }
   0x2 LB: > { %s625_s24 = sadd.s32 4294967295, %s743_s23   ;;  %p629_p0 = scmp.ge.s32.totalorder %s743_s23, 1  ;;  %s743_s23 = sphi %s784_s23, %s17_s23  }
   0x3   : > { %p223_p1 = scmp.lt.s32.totalorder %s743_s23, 3 }
   0x5   : > { %p224_p2 = pnand %p629_p0, %p223_p1 }
   0x6   : > { %p256_p3 = scmp.lt.s32.totalorder (!%p224_p2), %s625_s24, 1  ;;  %s531_s22 = sld [smem:[#allocation2]] (!%p224_p2) }
   0x7   : > { %227 = sbr.rel (%p224_p2) target bundleno = 645 (0x285), region = 44 }
   0xc   : > { %s885_s24 = smov (!%p256_p3, %s625_s24), 1  ;;  %v704_v4 = vld [vmem:[%s875_s2] sm:$0xff]  ;;  %vm316_vm0 = vcmask 261120   ;;  %v705_v8 = vld [vmem:[%s875_s2 + $0x8] sm:$0xff]  ;;  %v745_v13 = vmov 0   ;;  %v346_v14 = vld [vmem:[%s876_s3 + $0x10] sm:$0xff] }
   0xd   : > { %s692_s5 = sshll.u32 %s885_s24, 4  ;;  %s693_s25 = sshll.u32 %s885_s24, 6  ;;  %v344_v12 = vld [vmem:[%s876_s3] sm:$0xff]  ;;  %716 = vset.pattern.permute.xlu1 %v745_v13  ;;  %715 = vset.pattern.permute.xlu0 %v745_v13  ;;  %v345_v15 = vld [vmem:[%s876_s3 + $0x8] sm:$0xff]  ;;  %v347_v17 = vld [vmem:[%s876_s3 + $0x18] sm:$0xff] }
   0xe   : > { %s260_s28 = scalar_lea.vmem %s873_s0, %s692_s5  ;;  %s802_s7 = scalar_lea.vmem %s874_s1, %s693_s25  ;;  %350 = vperm.xlu1 %716, %v344_v12   ;;  %360 = vperm.xlu0 %715, %v346_v14  }
   0xf   : > { %v695_v0 = vld [vmem:[%s260_s28 + $0x8] sm:$0xff]  ;;  %v703_v1 = vld [vmem:[%s802_s7 + $0x38] sm:$0xff]  ;;  %v694_v2 = vld [vmem:[%s260_s28] sm:$0xff]  ;;  %s268_s26 = scalar_lea.vmem %s879_s6, %s885_s24 }
  0x10   : > { %329 = vmatpush.bf16.msra.mxu0 %v695_v0  ;;  %416 = vmatpush.bf16.msra.mxu1 %v703_v1  ;;  %v702_v3 = vld [vmem:[%s802_s7 + $0x30] sm:$0xff]  ;;  %v701_v5 = vld [vmem:[%s802_s7 + $0x28] sm:$0xff]  ;;  %v700_v6 = vld [vmem:[%s802_s7 + $0x20] sm:$0xff] }
  0x11   : > { %533 = vmatpush.bf16.msra.mxu3 %v703_v1  ;;  %v699_v7 = vld [vmem:[%s802_s7 + $0x18] sm:$0xff]  ;;  %v698_v9 = vld [vmem:[%s802_s7 + $0x10] sm:$0xff]  ;;  %v697_v10 = vld [vmem:[%s802_s7 + $0x8] sm:$0xff] }
  0x12   : > { %v696_v11 = vld [vmem:[%s802_s7] sm:$0xff] }
  0x14   : > { %330 = vmatpush.bf16.msra.mxu0 %v694_v2  ;;  %417 = vmatpush.bf16.msra.mxu1 %v702_v3 }
  0x15   : > { %534 = vmatpush.bf16.msra.mxu3 %v702_v3 }
  0x16   : > { %355 = vperm.xlu1 %716, %v345_v15   ;;  %365 = vperm.xlu0 %715, %v347_v17  }
  0x17   : > { %650 = vmatmul.msk.bf16.vlgmr.msra.gmra.mxu0 %vm316_vm0, %v704_v4 }
  0x18   : > { %418 = vmatpush.bf16.msra.mxu1 %v701_v5 }
  0x19   : > { %535 = vmatpush.bf16.msra.mxu3 %v701_v5 }
  0x1c   : > { %419 = vmatpush.bf16.msra.mxu1 %v700_v6 }
  0x1d   : > { %536 = vmatpush.bf16.msra.mxu3 %v700_v6 }
  0x20   : > { %420 = vmatpush.bf16.msra.mxu1 %v699_v7 }
  0x21   : > { %537 = vmatpush.bf16.msra.mxu3 %v699_v7 }
  0x24   : > { %421 = vmatpush.bf16.msra.mxu1 %v698_v9 }
  0x25   : > { %538 = vmatpush.bf16.msra.mxu3 %v698_v9 }
  0x27   : > { %651 = vmatmul.msk.bf16.gmra.mxu0 %vm316_vm0, %v705_v8 }
  0x28   : > { %422 = vmatpush.bf16.msra.mxu1 %v697_v10 }
  0x29   : > { %539 = vmatpush.bf16.msra.mxu3 %v697_v10 }
  0x2c   : > { %423 = vmatpush.bf16.msra.mxu1 %v696_v11 }
  0x2d   : > { %540 = vmatpush.bf16.msra.mxu3 %v696_v11 }
  0x80   : > { %v351_v23 = vpop.permute.xlu1 %350  ;;  %v361_v31 = vpop.permute.xlu0 %360 }
  0x88   : > { %v356_v26 = vpop.permute.xlu1 %355  ;;  %v366_v39 = vpop.permute.xlu0 %365 }
  0x94   : > { %v332_v16 = vpop.f32.mrf.mxu0 }
  0x9c   : > { %v334_v18 = vpop.f32.mrf.mxu0 }
  0x9d   : > { %v342_v19 = vpack.c.bf16 %v334_v18, %v332_v16 }
  0x9f   : > { %424 = vmatmul.bf16.vlgmr.msra.gmra.mxu1 %v342_v19 }
  0xa4   : > { %v337_v20 = vpop.f32.mrf.mxu0 }
  0xac   : > { %v339_v21 = vpop.f32.mrf.mxu0 }
  0xad   : > { %v343_v22 = vpack.c.bf16 %v339_v21, %v337_v20 }
  0xaf   : > { %429 = vmatmul.bf16.gmra.mxu1 %v343_v22 }
 0x11c   : > { %v425_v24 = vpop.f32.mrf.mxu1 }
 0x11d   : > { %v426_v25 = vadd.f32 %v425_v24, %v351_v23 }
 0x11f   : > { %v684_v29 = vmul.f32 -1.442695, %v426_v25 }
 0x121   : > { %717 = vpow2.f32 %v684_v29 }
 0x124   : > { %v427_v27 = vpop.f32.mrf.mxu1 }
 0x125   : > { %v428_v28 = vadd.f32 %v427_v27, %v356_v26  ;;  %v511_v27 = vld [vmem:[%s877_s4] sm:$0x1] }
 0x127   : > { %v685_v30 = vmul.f32 -1.442695, %v428_v28  ;;  %v718_v35 = vpop.eup %717 }
 0x128   : > { %v832_v37 = vadd.f32 1.0, %v718_v35 }
 0x129   : > { %719 = vpow2.f32 %v685_v30 }
 0x12a   : > { %vm456_vm1 = vweird.f32 %v832_v37  ;;  %v460_v14 = vand.u32 2147483647, %v832_v37  ;;  %v462_v15 = vand.u32 2147483648, %v832_v37 }
 0x12c   : > { %v430_v32 = vpop.f32.mrf.mxu1  ;;  %v463_v23 = vor.u32 1.1754944e-38, %v462_v15 }
 0x12d   : > { %v431_v33 = vadd.f32 %v430_v32, %v361_v31  ;;  %v532_v31 = vstv %s531_s22 }
 0x12f   : > { %v686_v34 = vmul.f32 -1.442695, %v431_v33  ;;  %v720_v36 = vpop.eup %719 }
 0x130   : > { %v834_v38 = vadd.f32 1.0, %v720_v36 }
 0x131   : > { %721 = vpow2.f32 %v686_v34 }
 0x132   : > { %723 = vrcp.f32 %v832_v37  ;;  %vm471_vm8 = vweird.f32 %v834_v38  ;;  %v475_v6 = vand.u32 2147483647, %v834_v38  ;;  %v477_v7 = vand.u32 2147483648, %v834_v38 }
 0x133   : > { %725 = vrcp.f32 %v834_v38 }
 0x134   : > { %v432_v40 = vpop.f32.mrf.mxu1  ;;  %v478_v20 = vor.u32 1.1754944e-38, %v477_v7  ;;  %vm476_vm15 = vcmp.eq.f32.partialorder %v475_v6, 8.507059e+37 }
 0x135   : > { %v433_v41 = vadd.f32 %v432_v40, %v366_v39 }
 0x137   : > { %v722_v42 = vpop.eup %721  ;;  %v687_v43 = vmul.f32 -1.442695, %v433_v41 }
 0x138   : > { %v449_v44 = vadd.f32 1.0, %v722_v42  ;;  %v724_v45 = vpop.eup %723 }
 0x139   : > { %727 = vpow2.f32 %v687_v43  ;;  %v726_v46 = vpop.eup %725  ;;  %v452_v52 = vmul.f32 %v724_v45, %v832_v37  ;;  %vm457_vm7 = vweird.f32 %v724_v45 }
 0x13a   : > { %729 = vrcp.f32 %v449_v44  ;;  %v467_v51 = vmul.f32 %v726_v46, %v834_v38  ;;  %vm472_vm3 = vweird.f32 %v726_v46  ;;  %vm486_vm4 = vweird.f32 %v449_v44  ;;  %vm458_vm14 = vmor %vm456_vm1, %vm457_vm7 }
 0x13b   : > { %v453_v55 = vsub.f32 1.0, %v452_v52  ;;  %v490_v63 = vand.u32 2147483647, %v449_v44  ;;  %v492_v0 = vand.u32 2147483648, %v449_v44  ;;  %vm851_vm10 = vmor %vm471_vm8, %vm472_vm3 }
 0x13c   : > { %v468_v54 = vsub.f32 1.0, %v467_v51 }
 0x13d   : > { %v454_v60 = vmul.f32 %v724_v45, %v453_v55  ;;  %v493_v12 = vor.u32 1.1754944e-38, %v492_v0  ;;  %vm491_vm12 = vcmp.eq.f32.partialorder %v490_v63, 8.507059e+37 }
 0x13e   : > { %v469_v59 = vmul.f32 %v726_v46, %v468_v54 }
 0x13f   : > { %v728_v47 = vpop.eup %727  ;;  %v455_v10 = vadd.f32 %v724_v45, %v454_v60 }
 0x140   : > { %v730_v48 = vpop.eup %729  ;;  %v450_v49 = vadd.f32 1.0, %v728_v47  ;;  %v470_v4 = vadd.f32 %v726_v46, %v469_v59 }
 0x141   : > { %v482_v50 = vmul.f32 %v730_v48, %v449_v44  ;;  %vm487_vm2 = vweird.f32 %v730_v48  ;;  %v459_v22 = vsel %vm458_vm14, %v724_v45, %v455_v10 }
 0x142   : > { %731 = vrcp.f32 %v450_v49  ;;  %v507_v1 = vand.u32 2147483648, %v450_v49  ;;  %v505_v3 = vand.u32 2147483647, %v450_v49  ;;  %vm841_vm6 = vmor %vm486_vm4, %vm487_vm2  ;;  %vm501_vm9 = vweird.f32 %v450_v49 }
 0x143   : > { %v483_v53 = vsub.f32 1.0, %v482_v50  ;;  %v474_v17 = vsel %vm851_vm10, %v726_v46, %v470_v4  ;;  %vm461_vm2 = vcmp.eq.f32.partialorder %v460_v14, 8.507059e+37 }
 0x144   : > { %v508_v13 = vor.u32 1.1754944e-38, %v507_v1  ;;  %vm506_vm13 = vcmp.eq.f32.partialorder %v505_v3, 8.507059e+37  ;;  %v479_v24 = vsel %vm476_vm15, %v478_v20, %v474_v17  ;;  %v464_v25 = vsel %vm461_vm2, %v463_v23, %v459_v22 }
 0x145   : > { %v484_v56 = vmul.f32 %v730_v48, %v483_v53  ;;  %v512_v26 = vpack.c.bf16 %v479_v24, %v464_v25 }
 0x147   : > { %v485_v61 = vadd.f32 %v730_v48, %v484_v56 }
 0x148   : > { %v732_v57 = vpop.eup %731 }
 0x149   : > { %v497_v58 = vmul.f32 %v732_v57, %v450_v49  ;;  %vm502_vm5 = vweird.f32 %v732_v57  ;;  %v489_v8 = vsel %vm841_vm6, %v730_v48, %v485_v61 }
 0x14a   : > { %vm503_vm11 = vmor %vm501_vm9, %vm502_vm5  ;;  %v494_v18 = vsel %vm491_vm12, %v493_v12, %v489_v8 }
 0x14b   : > { %v498_v62 = vsub.f32 1.0, %v497_v58 }
 0x14d   : > { %v499_v2 = vmul.f32 %v732_v57, %v498_v62 }
 0x14f   : > { %v500_v9 = vadd.f32 %v732_v57, %v499_v2 }
 0x151   : > { %v504_v16 = vsel %vm503_vm11, %v732_v57, %v500_v9 }
 0x152   : > { %v509_v19 = vsel %vm506_vm13, %v508_v13, %v504_v16 }
 0x153   : > { %v513_v21 = vpack.c.bf16 %v509_v19, %v494_v18 }
 0x155   : > { %523 = vmatpush.bf16.msra.mxu2 %v513_v21 }
 0x159   : > { %524 = vmatpush.bf16.msra.mxu2 %v512_v26 }
 0x15c   : > { %688 = vmatmul.msk.bf16.vlgmr.msra.gmra.mxu2 %vm316_vm0, %v511_v27 }
 0x1df   : > { %v526_v28 = vpop.f32.mrf.mxu2 }
 0x1e0   : > { %v530_v29 = vpack.c.bf16 %v526_v28, %v526_v28 }
 0x1e2   : > { %541 = vmatmul.bf16.vlgmr.msra.gmra.mxu3 %v530_v29 }
 0x1e7   : > { %v528_v30 = vpop.f32.mrf.mxu2 }
 0x265   : > { %v542_v32 = vpop.f32.mrf.mxu3 }
 0x266   : > { %v543_v33 = vadd.f32 %v542_v32, %v532_v31 }
 0x268   : > { %v689_v34 = vmul.f32 -1.442695, %v543_v33 }
 0x26a   : > { %733 = vpow2.f32 %v689_v34 }
 0x26d   : > { %v544_v35 = vpop.f32.mrf.mxu3 }
 0x270   : > { %v734_v36 = vpop.eup %733 }
 0x271   : > { %v549_v37 = vadd.f32 1.0, %v734_v36 }
 0x273   : > { %735 = vrcp.f32 %v549_v37  ;;  %v561_v41 = vand.u32 2147483648, %v549_v37  ;;  %v559_v43 = vand.u32 2147483647, %v549_v37  ;;  %vm555_vm1 = vweird.f32 %v549_v37 }
 0x275   : > { %v562_v45 = vor.u32 1.1754944e-38, %v561_v41  ;;  %vm560_vm4 = vcmp.eq.f32.partialorder %v559_v43, 8.507059e+37 }
 0x279   : > { %v736_v38 = vpop.eup %735 }
 0x27a   : > { %v551_v39 = vmul.f32 %v736_v38, %v549_v37  ;;  %vm556_vm0 = vweird.f32 %v736_v38 }
 0x27b   : > { %vm557_vm3 = vmor %vm555_vm1, %vm556_vm0 }
 0x27c   : > { %v552_v40 = vsub.f32 1.0, %v551_v39 }
 0x27e   : > { %v553_v42 = vmul.f32 %v736_v38, %v552_v40 }
 0x280   : > { %v554_v44 = vadd.f32 %v736_v38, %v553_v42 }
 0x282   : > { %v558_v46 = vsel %vm557_vm3, %v736_v38, %v554_v44 }
 0x283   : > { %v563_v47 = vsel %vm560_vm4, %v562_v45, %v558_v46 }
 0x284   : > { %565 = vst [vmem:[%s268_s26] sm:$0x1] %v563_v47 }
 0x285 PF: > { %s17_s23 = sadd.s32 1, %s743_s23  }
 0x286   : > { %p14_p4 = scmp.ge.s32.totalorder %s17_s23, 4  }
 0x288   :  { %16 = sbr.rel (!%p14_p4) target bundleno = 2 (0x2), region = 77 }

</bundles_post_ra>
